<compile_context>
chip_gen: v7x
topology: tpu7x:2x2x1
jax: 0.10.0
libtpu: 0.0.40
codegen_flags: <defaults>
</compile_context>

<pallas_src>
import functools

import jax
import jax.numpy as jnp
from jax.experimental import pallas as pl
from jax.experimental.pallas import tpu as pltpu


# ------------------------------- helpers ----------------------------------- #
def _round_up(x, m):
    return ((x + m - 1) // m) * m


def _pick_row_tile(T, dtype, max_tile=512):
    """Largest sublane-aligned divisor of T that is <= max_tile (full T if small)."""
    sub = 8 if dtype.itemsize >= 4 else (16 if dtype.itemsize == 2 else 32)
    if T <= max_tile:
        return T
    t = (max_tile // sub) * sub
    while t >= sub:
        if T % t == 0:
            return t
        t -= sub
    return T  # no aligned divisor: single full-row block (rare for PVT shapes)


def _heads_per_group(num_heads, head_dim):
    """Largest divisor of num_heads whose group width (g * head_dim) <= 128 lanes."""
    if head_dim >= 128:
        return 1
    cap = max(1, 128 // head_dim)
    best = 1
    for cand in range(1, num_heads + 1):
        if cand <= cap and num_heads % cand == 0:
            best = cand
    return best


def _build_pool_matrix(H, W, sr, m_pad, dtype):
    """(m_pad, H*W) matrix A so that A @ x == channel-last avg_pool2d(x, sr)."""
    Hp, Wp = H // sr, W // sr
    Np = Hp * Wp
    p = jnp.arange(m_pad, dtype=jnp.int32)[:, None]     # pooled token index (padded)
    r = jnp.arange(H * W, dtype=jnp.int32)[None, :]     # input token index
    hp, wp = p // Wp, p % Wp
    h, w = r // W, r % W
    hit = (p < Np) & ((h // sr) == hp) & ((w // sr) == wp)
    return jnp.where(hit, 1.0 / float(sr * sr), 0.0).astype(dtype)


# ----------------- fused avg-pool -> sr(1x1) -> LN -> kv ------------------- #
def _pool_sr_ln_kv_kernel(*refs, eps, sr, m_pad, n_real, num_groups, group_width):
    if sr > 1:
        a_ref, x_ref, srw_ref, srb_ref, g_ref, bt_ref, kvw_ref, kvb_ref, o_ref = refs
    else:
        x_ref, srw_ref, srb_ref, g_ref, bt_ref, kvw_ref, kvb_ref, o_ref = refs
    dt = x_ref.dtype
    C = x_ref.shape[-1]

    if sr > 1:
        # avg_pool2d as an MXU matmul with the (m_pad, N) pooling matrix.
        # Padded rows of A are all-zero -> padded tokens are zero (finite).
        pooled = jnp.dot(a_ref[...], x_ref[...],
                         preferred_element_type=jnp.float32)        # (m_pad, C)
    else:
        pooled = x_ref[...].astype(jnp.float32)
        if m_pad > n_real:
            pooled = jnp.concatenate(
                [pooled, jnp.zeros((m_pad - n_real, C), jnp.float32)], axis=0)

    # sr: 1x1 conv == channel matmul (+ bias), f32 accumulation on the MXU
    y = jnp.dot(pooled.astype(dt), srw_ref[...],
                preferred_element_type=jnp.float32) + srb_ref[...]
    # LayerNorm (f32 statistics)
    mu = jnp.mean(y, axis=-1, keepdims=True)
    var = jnp.mean(jnp.square(y - mu), axis=-1, keepdims=True)
    yn = (y - mu) * jax.lax.rsqrt(var + eps) * g_ref[...] + bt_ref[...]
    # kv projection straight out of VMEM (no HBM round trip of the normed act)
    kv = (jnp.dot(yn.astype(dt), kvw_ref[...],
                  preferred_element_type=jnp.float32) + kvb_ref[...]).astype(o_ref.dtype)

    # write k / v in 128-lane head-group-major layout expected by the attention
    # kernel: groups [0, G) are k, groups [G, 2G) are v.
    for g in range(num_groups):
        lo = g * group_width
        o_ref[g] = kv[:, lo:lo + group_width]
        o_ref[num_groups + g] = kv[:, C + lo:C + lo + group_width]


def pool_sr_ln_kv(x, H, W, sr_ratio, sr_w, sr_b, ln_g, ln_b, kv_w, kv_b, *,
                  num_heads, eps=1e-5):
    """x: (B, H*W, C) channel-last tokens -> grouped KV (B, 2G, M_pad, gw)."""
    B, N, C = x.shape
    assert N == H * W, "sequence length must equal H*W"
    assert H % sr_ratio == 0 and W % sr_ratio == 0
    head_dim = C // num_heads
    hpg = _heads_per_group(num_heads, head_dim)
    G = num_heads // hpg
    gw = hpg * head_dim
    Np = (H // sr_ratio) * (W // sr_ratio)
    m_pad = _round_up(Np, 128)
    C2 = kv_w.shape[1]

    nbytes = x.dtype.itemsize
    pool_flops = 2 * m_pad * N * C if sr_ratio > 1 else 0
    cost = pl.CostEstimate(
        flops=B * (pool_flops + 2 * m_pad * C * C + 2 * m_pad * C * C2
                   + 10 * m_pad * C),
        transcendentals=B * m_pad,
        bytes_accessed=nbytes * (B * N * C + m_pad * N + C * C + C * C2
                                 + 4 * C + C2 + B * 2 * G * m_pad * gw),
    )

    kernel = functools.partial(_pool_sr_ln_kv_kernel, eps=eps, sr=sr_ratio,
                               m_pad=m_pad, n_real=Np,
                               num_groups=G, group_width=gw)

    in_specs = [
        pl.BlockSpec((None, N, C), lambda b: (b, 0, 0)),    # per-image tokens
        pl.BlockSpec((C, C), lambda b: (0, 0)),             # sr_w   (VMEM resident)
        pl.BlockSpec((1, C), lambda b: (0, 0)),             # sr_b
        pl.BlockSpec((1, C), lambda b: (0, 0)),             # ln gamma
        pl.BlockSpec((1, C), lambda b: (0, 0)),             # ln beta
        pl.BlockSpec((C, C2), lambda b: (0, 0)),            # kv_w   (VMEM resident)
        pl.BlockSpec((1, C2), lambda b: (0, 0)),            # kv_b
    ]
    args = [x, sr_w, sr_b.reshape(1, C), ln_g.reshape(1, C), ln_b.reshape(1, C),
            kv_w, kv_b.reshape(1, C2)]
    if sr_ratio > 1:
        A = _build_pool_matrix(H, W, sr_ratio, m_pad, x.dtype)
        in_specs = [pl.BlockSpec((m_pad, N), lambda b: (0, 0))] + in_specs
        args = [A] + args

    kv = pl.pallas_call(
        kernel,
        out_shape=jax.ShapeDtypeStruct((B, 2 * G, m_pad, gw), x.dtype),
        grid=(B,),
        in_specs=in_specs,
        out_specs=pl.BlockSpec((None, 2 * G, m_pad, gw), lambda b: (b, 0, 0, 0)),
        compiler_params=pltpu.CompilerParams(dimension_semantics=("parallel",)),
        cost_estimate=cost,
    )(*args)
    return kv, Np


# ------------ fused q-proj -> multi-head attention -> out-proj ------------- #
def _fused_attn_kernel(x_ref, kv_ref, qw_ref, qb_ref, pw_ref, pb_ref, o_ref,
                       acc_ref, *, scale, head_dim, heads_per_group,
                       num_groups, m_actual):
    dt = x_ref.dtype
    m_pad = kv_ref.shape[1]

    # additive mask for zero-padded KV columns (one (1, M_pad) row per tile)
    if m_pad > m_actual:
        col = jax.lax.broadcasted_iota(jnp.int32, (1, m_pad), 1)
        pad_bias = jnp.where(col < m_actual, 0.0, -1e30).astype(jnp.float32)
    else:
        pad_bias = None

    acc_ref[...] = jnp.zeros_like(acc_ref)

    def group_body(g, carry):
        # q projection for this 128-lane head group; softmax scale folded in once.
        qg = (jnp.dot(x_ref[...], qw_ref[g], preferred_element_type=jnp.float32)
              + qb_ref[g]) * scale
        qg = qg.astype(dt)                       # (tq, gw)
        kg = kv_ref[g]                           # (m_pad, gw)
        vg = kv_ref[num_groups + g]              # (m_pad, gw)
        outs = []
        for i in range(heads_per_group):         # tiny static loop within a group
            hsl = slice(i * head_dim, (i + 1) * head_dim)
            # q @ k^T without materializing a transpose of k
            s = jax.lax.dot_general(qg[:, hsl], kg[:, hsl],
                                    (((1,), (1,)), ((), ())),
                                    preferred_element_type=jnp.float32)
            if pad_bias is not None:
                s = s + pad_bias
            s = s - jnp.max(s, axis=-1, keepdims=True)
            p = jnp.exp(s)
            inv = pl.reciprocal(jnp.sum(p, axis=-1, keepdims=True), approx=False)
            outs.append(jnp.dot(p.astype(dt), vg[:, hsl],
                                preferred_element_type=jnp.float32) * inv)
        og = outs[0] if heads_per_group == 1 else jnp.concatenate(outs, axis=-1)
        # fused output projection: this group's contribution to  attn_out @ proj_w
        acc_ref[...] += jnp.dot(og.astype(dt), pw_ref[g],
                                preferred_element_type=jnp.float32)
        return carry

    jax.lax.fori_loop(0, num_groups, group_body, 0)

    # single lane-dense (tq, C) store
    o_ref[...] = (acc_ref[...] + pb_ref[...]).astype(o_ref.dtype)


def fused_attention(x, kv_grouped, q_w, q_b, proj_w, proj_b, *, num_heads,
                    m_actual, max_tile=512):
    """x: (B, N, C); kv_grouped: (B, 2G, M_pad, gw) -> (B, N, C)."""
    B, N, C = x.shape
    head_dim = C // num_heads
    scale = float(head_dim) ** -0.5
    hpg = _heads_per_group(num_heads, head_dim)
    G = num_heads // hpg
    gw = hpg * head_dim
    Mp = kv_grouped.shape[2]
    tq = _pick_row_tile(N, x.dtype, max_tile)

    # head-group-major weight layouts (tiny one-time XLA reshapes of the weights)
    qw_g = q_w.reshape(C, G, gw).transpose(1, 0, 2)      # (G, C, gw)
    qb_g = q_b.reshape(G, 1, gw)                         # (G, 1, gw)
    pw_g = proj_w.reshape(G, gw, C)                      # (G, gw, C)
    pb2 = proj_b.reshape(1, C)

    nbytes = x.dtype.itemsize
    cost = pl.CostEstimate(
        flops=B * N * (4 * C * C + 4 * num_heads * Mp * head_dim),
        transcendentals=B * num_heads * N * Mp,
        bytes_accessed=nbytes * (2 * B * N * C + B * 2 * G * Mp * gw
                                 + 2 * C * C + 2 * C),
    )
    kernel = functools.partial(
        _fused_attn_kernel, scale=scale, head_dim=head_dim,
        heads_per_group=hpg, num_groups=G, m_actual=m_actual)

    return pl.pallas_call(
        kernel,
        out_shape=jax.ShapeDtypeStruct((B, N, C), x.dtype),
        grid=(B, N // tq),
        in_specs=[
            pl.BlockSpec((None, tq, C), lambda b, t: (b, t, 0)),           # x (streamed)
            pl.BlockSpec((None, 2 * G, Mp, gw), lambda b, t: (b, 0, 0, 0)),  # KV resident
            pl.BlockSpec((G, C, gw), lambda b, t: (0, 0, 0)),              # q_w resident
            pl.BlockSpec((G, 1, gw), lambda b, t: (0, 0, 0)),              # q_b
            pl.BlockSpec((G, gw, C), lambda b, t: (0, 0, 0)),              # proj_w resident
            pl.BlockSpec((1, C), lambda b, t: (0, 0)),                     # proj_b
        ],
        out_specs=pl.BlockSpec((None, tq, C), lambda b, t: (b, t, 0)),
        scratch_shapes=[pltpu.VMEM((tq, C), jnp.float32)],   # out-proj accumulator
        compiler_params=pltpu.CompilerParams(
            dimension_semantics=("parallel", "parallel")),
        cost_estimate=cost,
    )(x, kv_grouped, qw_g, qb_g, pw_g, pb2)


# ----------------------------- full forward -------------------------------- #
def attention_forward(params, x, H, W, *, num_heads, sr_ratio):
    kv, Np = pool_sr_ln_kv(x, H, W, sr_ratio,
                           params["sr_w"], params["sr_b"],
                           params["ln_g"], params["ln_b"],
                           params["kv_w"], params["kv_b"],
                           num_heads=num_heads)
    return fused_attention(x, kv, params["q_w"], params["q_b"],
                           params["proj_w"], params["proj_b"],
                           num_heads=num_heads, m_actual=Np)


# ---------------------------- pure-JAX reference ---------------------------- #
def attention_ref(params, x, H, W, *, num_heads, sr_ratio):
    hp = jax.lax.Precision.HIGHEST
    B, N, C = x.shape
    hd = C // num_heads
    scale = hd ** -0.5

    q = jnp.matmul(x, params["q_w"], precision=hp) + params["q_b"]
    q = q.reshape(B, N, num_heads, hd).transpose(0, 2, 1, 3)

    s = sr_ratio
    x_ = x.transpose(0, 2, 1).reshape(B, C, H, W)
    x_ = x_.reshape(B, C, H // s, s, W // s, s).mean(axis=(3, 5))
    Np = (H // s) * (W // s)
    x_ = x_.reshape(B, C, Np).transpose(0, 2, 1)
    x_ = jnp.matmul(x_, params["sr_w"], precision=hp) + params["sr_b"]

    mu = x_.mean(-1, keepdims=True)
    var = jnp.square(x_ - mu).mean(-1, keepdims=True)
    x_ = (x_ - mu) * jax.lax.rsqrt(var + 1e-5) * params["ln_g"] + params["ln_b"]

    kv = jnp.matmul(x_, params["kv_w"], precision=hp) + params["kv_b"]
    kv = kv.reshape(B, Np, 2, num_heads, hd).transpose(2, 0, 3, 1, 4)
    k, v = kv[0], kv[1]

    attn = jnp.einsum("bhnd,bhmd->bhnm", q, k, precision=hp) * scale
    attn = jax.nn.softmax(attn, axis=-1)
    o = jnp.einsum("bhnm,bhmd->bhnd", attn, v, precision=hp)
    o = o.transpose(0, 2, 1, 3).reshape(B, N, C)
    return jnp.matmul(o, params["proj_w"], precision=hp) + params["proj_b"]


# ------------------------------- params ------------------------------------ #
def init_params(key, C):
    ks = jax.random.split(key, 6)
    std = 0.05
    f32 = jnp.float32
    return {
        "q_w": jax.random.normal(ks[0], (C, C), f32) * std,
        "q_b": jnp.zeros((C,), f32),             # qkv_bias=False in the module
        "kv_w": jax.random.normal(ks[1], (C, 2 * C), f32) * std,
        "kv_b": jnp.zeros((2 * C,), f32),        # qkv_bias=False in the module
        "sr_w": jax.random.normal(ks[2], (C, C), f32) * std,  # 1x1 conv (Cin, Cout)
        "sr_b": jax.random.normal(ks[3], (C,), f32) * std,
        "ln_g": jnp.ones((C,), f32),
        "ln_b": jnp.zeros((C,), f32),
        "proj_w": jax.random.normal(ks[4], (C, C), f32) * std,
        "proj_b": jax.random.normal(ks[5], (C,), f32) * std,
    }


if __name__ == "__main__":
    configs = [
        # tiny PVT-ish block: exercises the pooled (sr_ratio=2) path
        dict(B=2, C=32, num_heads=4, sr_ratio=2, H=8, W=8),
        # larger channels: exercises the 128-lane head grouping (2 heads/group,
        # fori_loop over 2 groups) and the sr_ratio=1 (KV padded 64->128) path
        dict(B=2, C=256, num_heads=4, sr_ratio=1, H=8, W=8),
    ]
    key = jax.random.PRNGKey(0)
    for cfg in configs:
        key, kx, kp = jax.random.split(key, 3)
        B, C, H, W = cfg["B"], cfg["C"], cfg["H"], cfg["W"]
        N = H * W
        x = jax.random.normal(kx, (B, N, C), jnp.float32)
        params = init_params(kp, C)

        out = jax.block_until_ready(
            attention_forward(params, x, H, W, num_heads=cfg["num_heads"],
                              sr_ratio=cfg["sr_ratio"]))
        ref = attention_ref(params, x, H, W, num_heads=cfg["num_heads"],
                            sr_ratio=cfg["sr_ratio"])

        assert out.shape == (B, N, C)
        assert bool(jnp.isfinite(out).all())
        max_err = float(jnp.max(jnp.abs(out - ref)))
        assert bool(jnp.allclose(out, ref, atol=2e-2, rtol=2e-2)), (
            f"mismatch for {cfg}: max abs err {max_err}")
    print("KERNEL_OK")
</pallas_src>

<mosaic_0001>
module attributes {stable_mosaic.version = 11 : i64} {
  func.func @_pool_sr_ln_kv_kernel(%arg0: i32, %arg1: memref<128x64xf32, #tpu.memory_space<vmem>>, %arg2: memref<1x64x32xf32, #tpu.memory_space<vmem>>, %arg3: memref<32x32xf32, #tpu.memory_space<vmem>>, %arg4: memref<1x32xf32, #tpu.memory_space<vmem>>, %arg5: memref<1x32xf32, #tpu.memory_space<vmem>>, %arg6: memref<1x32xf32, #tpu.memory_space<vmem>>, %arg7: memref<32x64xf32, #tpu.memory_space<vmem>>, %arg8: memref<1x64xf32, #tpu.memory_space<vmem>>, %arg9: memref<1x2x128x32xf32, #tpu.memory_space<vmem>>) attributes {dimension_semantics = [#tpu.dimension_semantics<parallel>], iteration_bounds = array<i64: 2>, scalar_prefetch = 0 : i64, scratch_operands = 0 : i64, tpu.core_type = #tpu.core_type<tc>, window_params = [{pipeline_mode = #tpu.pipeline_mode<synchronous>, transform_indices = @transform_0, window_bounds = array<i64: 128, 64>}, {transform_indices = @transform_1, window_bounds = array<i64: 1, 64, 32>}, {pipeline_mode = #tpu.pipeline_mode<synchronous>, transform_indices = @transform_2, window_bounds = array<i64: 32, 32>}, {pipeline_mode = #tpu.pipeline_mode<synchronous>, transform_indices = @transform_3, window_bounds = array<i64: 1, 32>}, {pipeline_mode = #tpu.pipeline_mode<synchronous>, transform_indices = @transform_4, window_bounds = array<i64: 1, 32>}, {pipeline_mode = #tpu.pipeline_mode<synchronous>, transform_indices = @transform_5, window_bounds = array<i64: 1, 32>}, {pipeline_mode = #tpu.pipeline_mode<synchronous>, transform_indices = @transform_6, window_bounds = array<i64: 32, 64>}, {pipeline_mode = #tpu.pipeline_mode<synchronous>, transform_indices = @transform_7, window_bounds = array<i64: 1, 64>}, {transform_indices = @transform_8, window_bounds = array<i64: 1, 2, 128, 32>}]} {
    %c0 = arith.constant 0 : index
    %c0_0 = arith.constant 0 : index
    %0 = vector.load %arg1[%c0, %c0_0] : memref<128x64xf32, #tpu.memory_space<vmem>>, vector<128x64xf32>
    %c0_1 = arith.constant 0 : index
    %c0_2 = arith.constant 0 : index
    %c0_3 = arith.constant 0 : index
    %1 = vector.load %arg2[%c0_1, %c0_2, %c0_3] : memref<1x64x32xf32, #tpu.memory_space<vmem>>, vector<1x64x32xf32>
    %2 = vector.shape_cast %1 : vector<1x64x32xf32> to vector<64x32xf32>
    %cst = arith.constant dense<0.000000e+00> : vector<128x32xf32>
    %3 = tpu.matmul %0, %2, %cst {dimension_numbers = #tpu.dot_dimension_numbers<[1], [0], [0], [1], [0, 0, 1, 1], [], []>} : vector<128x64xf32>, vector<64x32xf32>, vector<128x32xf32> -> vector<128x32xf32>
    %c0_4 = arith.constant 0 : index
    %c0_5 = arith.constant 0 : index
    %4 = vector.load %arg3[%c0_4, %c0_5] : memref<32x32xf32, #tpu.memory_space<vmem>>, vector<32x32xf32>
    %cst_6 = arith.constant dense<0.000000e+00> : vector<128x32xf32>
    %5 = tpu.matmul %3, %4, %cst_6 {dimension_numbers = #tpu.dot_dimension_numbers<[1], [0], [0], [1], [0, 0, 1, 1], [], []>} : vector<128x32xf32>, vector<32x32xf32>, vector<128x32xf32> -> vector<128x32xf32>
    %c0_7 = arith.constant 0 : index
    %c0_8 = arith.constant 0 : index
    %6 = vector.load %arg4[%c0_7, %c0_8] : memref<1x32xf32, #tpu.memory_space<vmem>>, vector<1x32xf32>
    %7 = vector.broadcast %6 : vector<1x32xf32> to vector<128x32xf32>
    %8 = arith.addf %5, %7 : vector<128x32xf32>
    %cst_9 = arith.constant dense<0.000000e+00> : vector<128xf32>
    %9 = vector.multi_reduction <add>, %8, %cst_9 [1] : vector<128x32xf32> to vector<128xf32>
    %10 = vector.shape_cast %9 : vector<128xf32> to vector<128x1xf32>
    %cst_10 = arith.constant 3.200000e+01 : f32
    %11 = vector.broadcast %cst_10 : f32 to vector<128x1xf32>
    %12 = arith.divf %10, %11 : vector<128x1xf32>
    %13 = vector.broadcast %12 : vector<128x1xf32> to vector<128x32xf32>
    %14 = arith.subf %8, %13 : vector<128x32xf32>
    %15 = arith.mulf %14, %14 : vector<128x32xf32>
    %cst_11 = arith.constant dense<0.000000e+00> : vector<128xf32>
    %16 = vector.multi_reduction <add>, %15, %cst_11 [1] : vector<128x32xf32> to vector<128xf32>
    %17 = vector.shape_cast %16 : vector<128xf32> to vector<128x1xf32>
    %cst_12 = arith.constant 3.200000e+01 : f32
    %18 = vector.broadcast %cst_12 : f32 to vector<128x1xf32>
    %19 = arith.divf %17, %18 : vector<128x1xf32>
    %20 = vector.broadcast %12 : vector<128x1xf32> to vector<128x32xf32>
    %21 = arith.subf %8, %20 : vector<128x32xf32>
    %cst_13 = arith.constant 9.99999974E-6 : f32
    %22 = vector.broadcast %cst_13 : f32 to vector<128x1xf32>
    %23 = arith.addf %19, %22 : vector<128x1xf32>
    %24 = math.rsqrt %23 : vector<128x1xf32>
    %25 = vector.broadcast %24 : vector<128x1xf32> to vector<128x32xf32>
    %26 = arith.mulf %21, %25 : vector<128x32xf32>
    %c0_14 = arith.constant 0 : index
    %c0_15 = arith.constant 0 : index
    %27 = vector.load %arg5[%c0_14, %c0_15] : memref<1x32xf32, #tpu.memory_space<vmem>>, vector<1x32xf32>
    %28 = vector.broadcast %27 : vector<1x32xf32> to vector<128x32xf32>
    %29 = arith.mulf %26, %28 : vector<128x32xf32>
    %c0_16 = arith.constant 0 : index
    %c0_17 = arith.constant 0 : index
    %30 = vector.load %arg6[%c0_16, %c0_17] : memref<1x32xf32, #tpu.memory_space<vmem>>, vector<1x32xf32>
    %31 = vector.broadcast %30 : vector<1x32xf32> to vector<128x32xf32>
    %32 = arith.addf %29, %31 : vector<128x32xf32>
    %c0_18 = arith.constant 0 : index
    %c0_19 = arith.constant 0 : index
    %33 = vector.load %arg7[%c0_18, %c0_19] : memref<32x64xf32, #tpu.memory_space<vmem>>, vector<32x64xf32>
    %cst_20 = arith.constant dense<0.000000e+00> : vector<128x64xf32>
    %34 = tpu.matmul %32, %33, %cst_20 {dimension_numbers = #tpu.dot_dimension_numbers<[1], [0], [0], [1], [0, 0, 1, 1], [], []>} : vector<128x32xf32>, vector<32x64xf32>, vector<128x64xf32> -> vector<128x64xf32>
    %c0_21 = arith.constant 0 : index
    %c0_22 = arith.constant 0 : index
    %35 = vector.load %arg8[%c0_21, %c0_22] : memref<1x64xf32, #tpu.memory_space<vmem>>, vector<1x64xf32>
    %36 = vector.broadcast %35 : vector<1x64xf32> to vector<128x64xf32>
    %37 = arith.addf %34, %36 : vector<128x64xf32>
    %38 = vector.extract_strided_slice %37 {offsets = [0, 0], sizes = [128, 32], strides = [1, 1]} : vector<128x64xf32> to vector<128x32xf32>
    %c0_23 = arith.constant 0 : index
    %c0_24 = arith.constant 0 : index
    %c0_25 = arith.constant 0 : index
    %c0_26 = arith.constant 0 : index
    %39 = vector.load %arg9[%c0_23, %c0_24, %c0_25, %c0_26] : memref<1x2x128x32xf32, #tpu.memory_space<vmem>>, vector<1x1x128x32xf32>
    %40 = vector.shape_cast %39 : vector<1x1x128x32xf32> to vector<128x32xf32>
    %41 = vector.shape_cast %38 : vector<128x32xf32> to vector<1x1x128x32xf32>
    tpu.vector_store %arg9[%c0_23, %c0_24, %c0_25, %c0_26], %41 {strides = array<i32>} : memref<1x2x128x32xf32, #tpu.memory_space<vmem>>, vector<1x1x128x32xf32>,
    %42 = vector.extract_strided_slice %37 {offsets = [0, 32], sizes = [128, 32], strides = [1, 1]} : vector<128x64xf32> to vector<128x32xf32>
    %c0_27 = arith.constant 0 : index
    %c1 = arith.constant 1 : index
    %c0_28 = arith.constant 0 : index
    %c0_29 = arith.constant 0 : index
    %43 = vector.load %arg9[%c0_27, %c1, %c0_28, %c0_29] : memref<1x2x128x32xf32, #tpu.memory_space<vmem>>, vector<1x1x128x32xf32>
    %44 = vector.shape_cast %43 : vector<1x1x128x32xf32> to vector<128x32xf32>
    %45 = vector.shape_cast %42 : vector<128x32xf32> to vector<1x1x128x32xf32>
    tpu.vector_store %arg9[%c0_27, %c1, %c0_28, %c0_29], %45 {strides = array<i32>} : memref<1x2x128x32xf32, #tpu.memory_space<vmem>>, vector<1x1x128x32xf32>,
    return
  }
  func.func @transform_0(%arg0: i32) -> (i32, i32) {
    %c0_i32 = arith.constant 0 : i32
    %c0_i32_0 = arith.constant 0 : i32
    %c0_i32_1 = arith.constant 0 : i32
    return %c0_i32, %c0_i32_0 : i32, i32
  }
  func.func @transform_1(%arg0: i32) -> (i32, i32, i32) {
    %c0_i32 = arith.constant 0 : i32
    %c0_i32_0 = arith.constant 0 : i32
    %c0_i32_1 = arith.constant 0 : i32
    return %arg0, %c0_i32, %c0_i32_0 : i32, i32, i32
  }
  func.func @transform_2(%arg0: i32) -> (i32, i32) {
    %c0_i32 = arith.constant 0 : i32
    %c0_i32_0 = arith.constant 0 : i32
    %c0_i32_1 = arith.constant 0 : i32
    return %c0_i32, %c0_i32_0 : i32, i32
  }
  func.func @transform_3(%arg0: i32) -> (i32, i32) {
    %c0_i32 = arith.constant 0 : i32
    %c0_i32_0 = arith.constant 0 : i32
    %c0_i32_1 = arith.constant 0 : i32
    return %c0_i32, %c0_i32_0 : i32, i32
  }
  func.func @transform_4(%arg0: i32) -> (i32, i32) {
    %c0_i32 = arith.constant 0 : i32
    %c0_i32_0 = arith.constant 0 : i32
    %c0_i32_1 = arith.constant 0 : i32
    return %c0_i32, %c0_i32_0 : i32, i32
  }
  func.func @transform_5(%arg0: i32) -> (i32, i32) {
    %c0_i32 = arith.constant 0 : i32
    %c0_i32_0 = arith.constant 0 : i32
    %c0_i32_1 = arith.constant 0 : i32
    return %c0_i32, %c0_i32_0 : i32, i32
  }
  func.func @transform_6(%arg0: i32) -> (i32, i32) {
    %c0_i32 = arith.constant 0 : i32
    %c0_i32_0 = arith.constant 0 : i32
    %c0_i32_1 = arith.constant 0 : i32
    return %c0_i32, %c0_i32_0 : i32, i32
  }
  func.func @transform_7(%arg0: i32) -> (i32, i32) {
    %c0_i32 = arith.constant 0 : i32
    %c0_i32_0 = arith.constant 0 : i32
    %c0_i32_1 = arith.constant 0 : i32
    return %c0_i32, %c0_i32_0 : i32, i32
  }
  func.func @transform_8(%arg0: i32) -> (i32, i32, i32, i32) {
    %c0_i32 = arith.constant 0 : i32
    %c0_i32_0 = arith.constant 0 : i32
    %c0_i32_1 = arith.constant 0 : i32
    %c0_i32_2 = arith.constant 0 : i32
    return %arg0, %c0_i32, %c0_i32_0, %c0_i32_1 : i32, i32, i32, i32
  }
}

</mosaic_0001>

<bundles_post_ra>
// kernel: tpu_custom_call.1
= control target key start
LH: loop header
LB: loop body
LE: loop exit
PB: predicated region body
PF: predicated region fallthrough
CT: control target
= control target key end

     0   :  { %s1720_s27 = smov 0   ;;  %s2167_s0 = inlined_call_operand.vmem [shape: f32[128,64], index: 0, kind: input, shape index: {}]   ;;  %s2168_s1 = inlined_call_operand.vmem [shape: f32[2,64,32], index: 1, kind: input, shape index: {}]   ;;  %s2169_s2 = inlined_call_operand.vmem [shape: f32[32,32], index: 2, kind: input, shape index: {}]   ;;  %s2170_s3 = inlined_call_operand.vmem [shape: f32[1,32], index: 3, kind: input, shape index: {}]   ;;  %s2171_s4 = inlined_call_operand.vmem [shape: f32[1,32], index: 4, kind: input, shape index: {}]   ;;  %s2172_s5 = inlined_call_operand.vmem [shape: f32[1,32], index: 5, kind: input, shape index: {}]   ;;  %s2173_s6 = inlined_call_operand.vmem [shape: f32[32,64], index: 6, kind: input, shape index: {}]   ;;  %s2174_s7 = inlined_call_operand.vmem [shape: f32[1,64], index: 7, kind: input, shape index: {}]   ;;  %s2175_s8 = inlined_call_operand.vmem [shape: f32[2,2,128,32], index: 8, kind: output, shape index: {}]  }
   0x1 LB: > { %s1340_s28 = sadd.s32 4294967295, %s1672_s27   ;;  %p1344_p0 = scmp.ge.s32.totalorder %s1672_s27, 1  ;;  %s1672_s27 = sphi %s1720_s27, %s18_s27  }
   0x2   : > { %p262_p1 = scmp.lt.s32.totalorder %s1672_s27, 3 }
   0x4   : > { %p263_p2 = pnand %p1344_p0, %p262_p1 }
   0x5   : > { %p296_p3 = scmp.lt.s32.totalorder (!%p263_p2), %s1340_s28, 1  ;;  %v306_v0 = vld [vmem:[%s2167_s0] sm:$0xff] (!%p263_p2)  ;;  %vm330_vm0 = vcmask (!%p263_p2), 523264   ;;  %v525_v2 = vld [vmem:[%s2169_s2 + $0x8] sm:$0xff] (!%p263_p2)  ;;  %v526_v12 = vld [vmem:[%s2169_s2 + $0x10] sm:$0xff] (!%p263_p2)  ;;  %vm535_vm1 = vcmask (!%p263_p2), 261120  }
   0x6   : > { %266 = sbr.rel (%p263_p2) target bundleno = 1143 (0x477), region = 52  ;;  %1501 = vmatprep.mubr.msk.f32.mxu0 (!%p263_p2), %vm330_vm0, %v306_v0  ;;  %v524_v1 = vld [vmem:[%s2169_s2] sm:$0xff] (!%p263_p2)  ;;  %v527_v13 = vld [vmem:[%s2169_s2 + $0x18] sm:$0xff] (!%p263_p2)  ;;  %v307_v19 = vld [vmem:[%s2167_s0 + $0x8] sm:$0xff] (!%p263_p2) }
   0x7   : > { %v1605_v6 = vpack.c.bf16 (!%p263_p2), %v525_v2, %v524_v1  ;;  %v1609_v14 = vpack.c.bf16 (!%p263_p2), %v527_v13, %v526_v12  ;;  %v308_v20 = vld [vmem:[%s2167_s0 + $0x10] sm:$0xff] (!%p263_p2)  ;;  %v309_v21 = vld [vmem:[%s2167_s0 + $0x18] sm:$0xff] (!%p263_p2)  ;;  %v310_v22 = vld [vmem:[%s2167_s0 + $0x20] sm:$0xff] (!%p263_p2) }
   0x8   : > { %v311_v23 = vld [vmem:[%s2167_s0 + $0x28] sm:$0xff] (!%p263_p2)  ;;  %v312_v24 = vld [vmem:[%s2167_s0 + $0x30] sm:$0xff] (!%p263_p2)  ;;  %v313_v25 = vld [vmem:[%s2167_s0 + $0x38] sm:$0xff] (!%p263_p2) }
   0x9   : > { %1621 = vmatprep.subr.bf16.mxu1 (!%p263_p2), %v1605_v6  ;;  %v314_v26 = vld [vmem:[%s2167_s0 + $0x40] sm:$0xff] (!%p263_p2)  ;;  %v315_v27 = vld [vmem:[%s2167_s0 + $0x48] sm:$0xff] (!%p263_p2)  ;;  %v316_v28 = vld [vmem:[%s2167_s0 + $0x50] sm:$0xff] (!%p263_p2) }
   0xa   : > { %1623 = vmatpush3.bf16.msra.mxu1 (!%p263_p2), %v1605_v6  ;;  %v317_v29 = vld [vmem:[%s2167_s0 + $0x58] sm:$0xff] (!%p263_p2)  ;;  %v318_v30 = vld [vmem:[%s2167_s0 + $0x60] sm:$0xff] (!%p263_p2)  ;;  %v319_v31 = vld [vmem:[%s2167_s0 + $0x68] sm:$0xff] (!%p263_p2) }
   0xb   : > { %1622 = vmatprep.subr.bf16.mxu1 (!%p263_p2), %v1609_v14  ;;  %v320_v32 = vld [vmem:[%s2167_s0 + $0x70] sm:$0xff] (!%p263_p2)  ;;  %v321_v33 = vld [vmem:[%s2167_s0 + $0x78] sm:$0xff] (!%p263_p2)  ;;  %v1365_v50 = vld [vmem:[%s2170_s3] ss:$0 sm:$0xff] (!%p263_p2) }
   0xd   : > { %s2177_s28 = smov (!%p296_p3, %s1340_s28), 1 }
   0xe   : > { %s1419_s9 = sshll.u32 %s2177_s28, 6  ;;  %1624 = vmatpush3.bf16.msra.mxu1 %v1609_v14  ;;  %s1420_s25 = sshll.u32 %s2177_s28, 8 }
   0xf   : > { %s300_s12 = scalar_lea.vmem %s2168_s1, %s1419_s9  ;;  %s2082_s10 = scalar_lea.vmem %s2175_s8, %s1420_s25 }
  0x10   : > { %v322_v3 = vld [vmem:[%s300_s12] sm:$0xff]  ;;  %v323_v4 = vld [vmem:[%s300_s12 + $0x8] sm:$0xff]  ;;  %v324_v5 = vld [vmem:[%s300_s12 + $0x10] sm:$0xff]  ;;  %s1674_s28 = smov 96  }
  0x11   : > { %v1589_v7 = vpack.c.bf16 %v323_v4, %v322_v3  ;;  %v325_v8 = vld [vmem:[%s300_s12 + $0x18] sm:$0xff]  ;;  %v326_v10 = vld [vmem:[%s300_s12 + $0x20] sm:$0xff]  ;;  %v327_v11 = vld [vmem:[%s300_s12 + $0x28] sm:$0xff] }
  0x12   : > { %v1593_v9 = vpack.c.bf16 %v325_v8, %v324_v5  ;;  %v1597_v15 = vpack.c.bf16 %v327_v11, %v326_v10  ;;  %v328_v16 = vld [vmem:[%s300_s12 + $0x30] sm:$0xff]  ;;  %v329_v17 = vld [vmem:[%s300_s12 + $0x38] sm:$0xff] }
  0x13   : > { %1590 = vmatprep.subr.bf16.mxu0 %v1589_v7  ;;  %v1601_v18 = vpack.c.bf16 %v329_v17, %v328_v16 }
  0x14   : > { %1592 = vmatpush3.bf16.msra.mxu0 %v1589_v7 }
  0x15   : > { %1594 = vmatprep.subr.bf16.mxu0 %v1593_v9 }
  0x18   : > { %1596 = vmatpush3.bf16.msra.mxu0 %v1593_v9 }
  0x19   : > { %1598 = vmatprep.subr.bf16.mxu0 %v1597_v15 }
  0x1c   : > { %1600 = vmatpush3.bf16.msra.mxu0 %v1597_v15 }
  0x1d   : > { %1602 = vmatprep.subr.bf16.mxu0 %v1601_v18 }
  0x20   : > { %1604 = vmatpush3.bf16.msra.mxu0 %v1601_v18 }
  0x21   : > { %1606 = vmatprep.subr.bf16.mxu0 %v1605_v6 }
  0x23   : > { %1502 = vmatmul.mubr.msk.f32.vlgmr.msra.gmra.mrb[0].mxu0 %vm330_vm0, %v307_v19 }
  0x24   : > { %1504 = vmatprep.mubr.msk.f32.mxu0 %vm330_vm0, %v308_v20  ;;  %1608 = vmatpush3.bf16.msra.mxu0 %v1605_v6 }
  0x25   : > { %1610 = vmatprep.subr.bf16.mxu0 %v1609_v14 }
  0x27   : > { %1505 = vmatmul.mubr.msk.f32.gmra.mrb[2].mxu0 %vm330_vm0, %v309_v21 }
  0x28   : > { %1507 = vmatprep.mubr.msk.f32.mxu0 %vm330_vm0, %v310_v22  ;;  %1612 = vmatpush3.bf16.msra.mxu0 %v1609_v14 }
  0x2b   : > { %1508 = vmatmul.mubr.msk.f32.gmra.mrb[4].mxu0 %vm330_vm0, %v311_v23 }
  0x2c   : > { %1510 = vmatprep.mubr.msk.f32.mxu0 %vm330_vm0, %v312_v24 }
  0x2f   : > { %1511 = vmatmul.mubr.msk.f32.gmra.mrb[6].mxu0 %vm330_vm0, %v313_v25 }
  0x30   : > { %1513 = vmatprep.mubr.msk.f32.mxu0 %vm330_vm0, %v314_v26 }
  0x33   : > { %1514 = vmatmul.mubr.msk.f32.gmra.mrb[8].mxu0 %vm330_vm0, %v315_v27 }
  0x34   : > { %1516 = vmatprep.mubr.msk.f32.mxu0 %vm330_vm0, %v316_v28 }
  0x37   : > { %1517 = vmatmul.mubr.msk.f32.gmra.mrb[10].mxu0 %vm330_vm0, %v317_v29 }
  0x38   : > { %1519 = vmatprep.mubr.msk.f32.mxu0 %vm330_vm0, %v318_v30 }
  0x3b   : > { %1520 = vmatmul.mubr.msk.f32.gmra.mrb[12].mxu0 %vm330_vm0, %v319_v31 }
  0x3c   : > { %1522 = vmatprep.mubr.msk.f32.mxu0 %vm330_vm0, %v320_v32 }
  0x3f   : > { %1523 = vmatmul.mubr.msk.f32.gmra.mrb[14].mxu0 %vm330_vm0, %v321_v33 }
  0xf6   : > { %v1503_v34 = vpop.f32.mrb[0].mxu0 }
  0xf7   : > { %v445_v35 = vpop.f32.mrb[1].mxu0 }
  0xf8   : > { %1533 = vmatprep.mubr.msk.f32.mxu0 %vm535_vm1, %v445_v35 }
  0xf9   : > { %1534 = vmatmul.mubr.msk.f32.vlgmr.msra.gmra.mrb[16].mxu0 %vm535_vm1, %v1503_v34 }
  0xfa   : > { %v1506_v36 = vpop.f32.mrb[2].mxu0 }
  0xfb   : > { %v455_v37 = vpop.f32.mrb[3].mxu0 }
  0xfc   : > { %1536 = vmatprep.mubr.msk.f32.mxu0 %vm535_vm1, %v455_v37 }
  0xfd   : > { %1537 = vmatmul.mubr.msk.f32.gmra.mrb[18].mxu0 %vm535_vm1, %v1506_v36 }
  0xfe   : > { %v1509_v38 = vpop.f32.mrb[4].mxu0 }
  0xff   : > { %v465_v39 = vpop.f32.mrb[5].mxu0 }
 0x100   : > { %1539 = vmatprep.mubr.msk.f32.mxu0 %vm535_vm1, %v465_v39 }
 0x101   : > { %1540 = vmatmul.mubr.msk.f32.gmra.mrb[20].mxu0 %vm535_vm1, %v1509_v38 }
 0x102   : > { %v1512_v40 = vpop.f32.mrb[6].mxu0 }
 0x103   : > { %v475_v41 = vpop.f32.mrb[7].mxu0 }
 0x104   : > { %1542 = vmatprep.mubr.msk.f32.mxu1 %vm535_vm1, %v475_v41 }
 0x105   : > { %1543 = vmatmul.mubr.msk.f32.vlgmr.msra.gmra.mrb[0].mxu1 %vm535_vm1, %v1512_v40 }
 0x106   : > { %v1515_v42 = vpop.f32.mrb[8].mxu0 }
 0x107   : > { %v485_v43 = vpop.f32.mrb[9].mxu0 }
 0x108   : > { %1545 = vmatprep.mubr.msk.f32.mxu1 %vm535_vm1, %v485_v43 }
 0x109   : > { %1546 = vmatmul.mubr.msk.f32.gmra.mrb[2].mxu1 %vm535_vm1, %v1515_v42 }
 0x10a   : > { %v1518_v44 = vpop.f32.mrb[10].mxu0 }
 0x10b   : > { %v495_v45 = vpop.f32.mrb[11].mxu0 }
 0x10c   : > { %1548 = vmatprep.mubr.msk.f32.mxu1 %vm535_vm1, %v495_v45 }
 0x10d   : > { %1549 = vmatmul.mubr.msk.f32.gmra.mrb[4].mxu1 %vm535_vm1, %v1518_v44 }
 0x10e   : > { %v1521_v46 = vpop.f32.mrb[12].mxu0 }
 0x10f   : > { %v505_v47 = vpop.f32.mrb[13].mxu0 }
 0x110   : > { %1551 = vmatprep.mubr.msk.f32.mxu1 %vm535_vm1, %v505_v47 }
 0x111   : > { %1552 = vmatmul.mubr.msk.f32.gmra.mrb[6].mxu1 %vm535_vm1, %v1521_v46 }
 0x112   : > { %v1524_v48 = vpop.f32.mrb[14].mxu0 }
 0x113   : > { %v515_v49 = vpop.f32.mrb[15].mxu0 }
 0x114   : > { %1554 = vmatprep.mubr.msk.f32.mxu1 %vm535_vm1, %v515_v49 }
 0x115   : > { %1555 = vmatmul.mubr.msk.f32.gmra.mrb[8].mxu1 %vm535_vm1, %v1524_v48 }
 0x1cc   : > { %v1535_v51 = vpop.f32.mrb[16].mxu0 }
 0x1cd   : > { %v650_v52 = vpop.f32.mrb[17].mxu0  ;;  %v1831_v54 = vadd.f32 %v1535_v51, %v1365_v50 }
 0x1ce   : > { %v1829_v53 = vadd.f32 %v1365_v50, %v650_v52 }
 0x1cf   : > { %v732_v62 = vsel %vm535_vm1, %v1831_v54, 0.0 }
 0x1d0   : > { %v1538_v55 = vpop.f32.mrb[18].mxu0  ;;  %v729_v56 = vsel %vm535_vm1, %v1829_v53, 0.0 }
 0x1d1   : > { %v660_v57 = vpop.f32.mrb[19].mxu0  ;;  %730 = vadd.xlane.f32.xlu0 %v729_v56  ;;  %v1837_v59 = vadd.f32 %v1538_v55, %v1365_v50 }
 0x1d2   : > { %v1835_v58 = vadd.f32 %v1365_v50, %v660_v57 }
 0x1d3   : > { %v738_v3 = vsel %vm535_vm1, %v1837_v59, 0.0 }
 0x1d4   : > { %v1541_v60 = vpop.f32.mrb[20].mxu0  ;;  %v735_v61 = vsel %vm535_vm1, %v1835_v58, 0.0 }
 0x1d5   : > { %v670_v63 = vpop.f32.mrb[21].mxu0  ;;  %736 = vadd.xlane.f32.xlu1 %v735_v61  ;;  %733 = vadd.xlane.f32.xlu0 %v732_v62  ;;  %v1843_v0 = vadd.f32 %v1541_v60, %v1365_v50 }
 0x1d6   : > { %v1845_v1 = vadd.f32 %v1365_v50, %v670_v63 }
 0x1d7   : > { %v744_v8 = vsel %vm535_vm1, %v1843_v0, 0.0 }
 0x1d8   : > { %v1544_v2 = vpop.f32.mrb[0].mxu1  ;;  %v741_v4 = vsel %vm535_vm1, %v1845_v1, 0.0 }
 0x1d9   : > { %v680_v5 = vpop.f32.mrb[1].mxu1  ;;  %739 = vadd.xlane.f32.xlu1 %v738_v3  ;;  %742 = vadd.xlane.f32.xlu0 %v741_v4  ;;  %v1851_v6 = vadd.f32 %v1544_v2, %v1365_v50 }
 0x1da   : > { %v1853_v7 = vadd.f32 %v1365_v50, %v680_v5 }
 0x1db   : > { %v750_v14 = vsel %vm535_vm1, %v1851_v6, 0.0 }
 0x1dc   : > { %v1547_v9 = vpop.f32.mrb[2].mxu1  ;;  %v747_v10 = vsel %vm535_vm1, %v1853_v7, 0.0 }
 0x1dd   : > { %v690_v11 = vpop.f32.mrb[3].mxu1  ;;  %745 = vadd.xlane.f32.xlu1 %v744_v8  ;;  %748 = vadd.xlane.f32.xlu0 %v747_v10  ;;  %v1859_v12 = vadd.f32 %v1547_v9, %v1365_v50 }
 0x1de   : > { %v1861_v13 = vadd.f32 %v1365_v50, %v690_v11 }
 0x1df   : > { %v756_v20 = vsel %vm535_vm1, %v1859_v12, 0.0 }
 0x1e0   : > { %v1550_v15 = vpop.f32.mrb[4].mxu1  ;;  %v753_v16 = vsel %vm535_vm1, %v1861_v13, 0.0 }
 0x1e1   : > { %v700_v17 = vpop.f32.mrb[5].mxu1  ;;  %751 = vadd.xlane.f32.xlu1 %v750_v14  ;;  %754 = vadd.xlane.f32.xlu0 %v753_v16  ;;  %v1867_v18 = vadd.f32 %v1550_v15, %v1365_v50 }
 0x1e2   : > { %v1869_v19 = vadd.f32 %v1365_v50, %v700_v17 }
 0x1e3   : > { %v762_v26 = vsel %vm535_vm1, %v1867_v18, 0.0 }
 0x1e4   : > { %v1553_v21 = vpop.f32.mrb[6].mxu1  ;;  %v759_v22 = vsel %vm535_vm1, %v1869_v19, 0.0 }
 0x1e5   : > { %v710_v23 = vpop.f32.mrb[7].mxu1  ;;  %757 = vadd.xlane.f32.xlu1 %v756_v20  ;;  %760 = vadd.xlane.f32.xlu0 %v759_v22  ;;  %v1875_v24 = vadd.f32 %v1553_v21, %v1365_v50 }
 0x1e6   : > { %v1877_v25 = vadd.f32 %v1365_v50, %v710_v23 }
 0x1e7   : > { %v768_v32 = vsel %vm535_vm1, %v1875_v24, 0.0 }
 0x1e8   : > { %v1556_v27 = vpop.f32.mrb[8].mxu1  ;;  %v765_v28 = vsel %vm535_vm1, %v1877_v25, 0.0 }
 0x1e9   : > { %v720_v29 = vpop.f32.mrb[9].mxu1  ;;  %763 = vadd.xlane.f32.xlu1 %v762_v26  ;;  %766 = vadd.xlane.f32.xlu0 %v765_v28  ;;  %v1883_v30 = vadd.f32 %v1556_v27, %v1365_v50 }
 0x1ea   : > { %v1885_v31 = vadd.f32 %v1365_v50, %v720_v29 }
 0x1eb   : > { %v774_v34 = vsel %vm535_vm1, %v1883_v30, 0.0 }
 0x1ec   : > { %v771_v33 = vsel %vm535_vm1, %v1885_v31, 0.0 }
 0x1ed   : > { %769 = vadd.xlane.f32.xlu1 %v768_v32  ;;  %772 = vadd.xlane.f32.xlu0 %v771_v33 }
 0x1f1   : > { %775 = vadd.xlane.f32.xlu1 %v774_v34 }
 0x25e   : > { %v731_v35 = vpop.xlane.xlu0 %730 }
 0x25f   : > { %v778_v36 = vmul.f32 0.03125, %v731_v35 }
 0x261   : > { %v1894_v37 = vsub.f32 %v1829_v53, %v778_v36 }
 0x262   : > { %v737_v38 = vpop.xlane.xlu1 %736  ;;  %v734_v39 = vpop.xlane.xlu0 %733 }
 0x263   : > { %v780_v40 = vmul.f32 0.03125, %v737_v38  ;;  %v779_v41 = vmul.f32 0.03125, %v734_v39  ;;  %v810_v42 = vmul.f32 %v1894_v37, %v1894_v37 }
 0x265   : > { %v1899_v43 = vsub.f32 %v1835_v58, %v780_v40  ;;  %v1902_v44 = vsub.f32 %v1831_v54, %v779_v41  ;;  %v826_v45 = vsel %vm535_vm1, %v810_v42, 0.0 }
 0x266   : > { %v740_v46 = vpop.xlane.xlu1 %739  ;;  %827 = vadd.xlane.f32.xlu0 %v826_v45  ;;  %v743_v47 = vpop.xlane.xlu0 %742 }
 0x267   : > { %v781_v48 = vmul.f32 0.03125, %v740_v46  ;;  %v782_v49 = vmul.f32 0.03125, %v743_v47  ;;  %v812_v50 = vmul.f32 %v1899_v43, %v1899_v43  ;;  %v811_v51 = vmul.f32 %v1902_v44, %v1902_v44 }
 0x269   : > { %v1910_v52 = vsub.f32 %v1837_v59, %v781_v48  ;;  %v1913_v53 = vsub.f32 %v1845_v1, %v782_v49  ;;  %v832_v54 = vsel %vm535_vm1, %v812_v50, 0.0  ;;  %v829_v55 = vsel %vm535_vm1, %v811_v51, 0.0 }
 0x26a   : > { %v746_v56 = vpop.xlane.xlu1 %745  ;;  %833 = vadd.xlane.f32.xlu0 %v832_v54  ;;  %830 = vadd.xlane.f32.xlu1 %v829_v55  ;;  %v749_v57 = vpop.xlane.xlu0 %748 }
 0x26b   : > { %v783_v58 = vmul.f32 0.03125, %v746_v56  ;;  %v784_v60 = vmul.f32 0.03125, %v749_v57  ;;  %v813_v61 = vmul.f32 %v1910_v52, %v1910_v52  ;;  %v814_v59 = vmul.f32 %v1913_v53, %v1913_v53  ;;  %v984_v56 = vld [vmem:[%s2173_s6] sm:$0xff]  ;;  %v985_v57 = vld [vmem:[%s2173_s6 + $0x8] sm:$0xff] }
 0x26d   : > { %v1922_v62 = vsub.f32 %v1843_v0, %v783_v58  ;;  %v1925_v63 = vsub.f32 %v1853_v7, %v784_v60  ;;  %v835_v1 = vsel %vm535_vm1, %v813_v61, 0.0  ;;  %v838_v2 = vsel %vm535_vm1, %v814_v59, 0.0  ;;  %v986_v60 = vld [vmem:[%s2173_s6 + $0x10] sm:$0xff]  ;;  %v987_v61 = vld [vmem:[%s2173_s6 + $0x18] sm:$0xff] }
 0x26e   : > { %v752_v3 = vpop.xlane.xlu1 %751  ;;  %836 = vadd.xlane.f32.xlu1 %v835_v1  ;;  %839 = vadd.xlane.f32.xlu0 %v838_v2  ;;  %v755_v4 = vpop.xlane.xlu0 %754  ;;  %v1613_v58 = vpack.c.bf16 %v985_v57, %v984_v56  ;;  %v1617_v59 = vpack.c.bf16 %v987_v61, %v986_v60 }
 0x26f   : > { %v785_v5 = vmul.f32 0.03125, %v752_v3  ;;  %v786_v8 = vmul.f32 0.03125, %v755_v4  ;;  %v815_v9 = vmul.f32 %v1922_v62, %v1922_v62  ;;  %v816_v0 = vmul.f32 %v1925_v63, %v1925_v63 }
 0x270   : > { %1614 = vmatprep.subr.bf16.mxu1 %v1613_v58 }
 0x271   : > { %v1934_v10 = vsub.f32 %v1851_v6, %v785_v5  ;;  %v1937_v7 = vsub.f32 %v1861_v13, %v786_v8  ;;  %v841_v11 = vsel %vm535_vm1, %v815_v9, 0.0  ;;  %v844_v14 = vsel %vm535_vm1, %v816_v0, 0.0  ;;  %1616 = vmatpush3.bf16.msra.mxu1 %v1613_v58 }
 0x272   : > { %v758_v15 = vpop.xlane.xlu1 %757  ;;  %842 = vadd.xlane.f32.xlu1 %v841_v11  ;;  %845 = vadd.xlane.f32.xlu0 %v844_v14  ;;  %v761_v16 = vpop.xlane.xlu0 %760 }
 0x273   : > { %v787_v17 = vmul.f32 0.03125, %v758_v15  ;;  %v788_v20 = vmul.f32 0.03125, %v761_v16  ;;  %v817_v21 = vmul.f32 %v1934_v10, %v1934_v10  ;;  %v818_v6 = vmul.f32 %v1937_v7, %v1937_v7  ;;  %1618 = vmatprep.subr.bf16.mxu1 %v1617_v59 }
 0x275   : > { %v1946_v22 = vsub.f32 %v1859_v12, %v787_v17  ;;  %v1949_v13 = vsub.f32 %v1869_v19, %v788_v20  ;;  %v847_v23 = vsel %vm535_vm1, %v817_v21, 0.0  ;;  %v850_v26 = vsel %vm535_vm1, %v818_v6, 0.0  ;;  %1620 = vmatpush3.bf16.msra.mxu1 %v1617_v59 }
 0x276   : > { %v764_v27 = vpop.xlane.xlu1 %763  ;;  %848 = vadd.xlane.f32.xlu1 %v847_v23  ;;  %851 = vadd.xlane.f32.xlu0 %v850_v26  ;;  %v767_v28 = vpop.xlane.xlu0 %766 }
 0x277   : > { %v789_v29 = vmul.f32 0.03125, %v764_v27  ;;  %v790_v32 = vmul.f32 0.03125, %v767_v28  ;;  %v819_v33 = vmul.f32 %v1946_v22, %v1946_v22  ;;  %v820_v12 = vmul.f32 %v1949_v13, %v1949_v13 }
 0x279   : > { %v1958_v34 = vsub.f32 %v1867_v18, %v789_v29  ;;  %v1961_v19 = vsub.f32 %v1877_v25, %v790_v32  ;;  %v853_v35 = vsel %vm535_vm1, %v819_v33, 0.0  ;;  %v856_v36 = vsel %vm535_vm1, %v820_v12, 0.0  ;;  %v2004_v29 = vld [vmem:[%s2171_s4] ss:$0 sm:$0xff] }
 0x27a   : > { %v770_v38 = vpop.xlane.xlu1 %769  ;;  %854 = vadd.xlane.f32.xlu1 %v853_v35  ;;  %857 = vadd.xlane.f32.xlu0 %v856_v36  ;;  %v773_v39 = vpop.xlane.xlu0 %772 }
 0x27b   : > { %v791_v40 = vmul.f32 0.03125, %v770_v38  ;;  %v792_v41 = vmul.f32 0.03125, %v773_v39  ;;  %v821_v42 = vmul.f32 %v1958_v34, %v1958_v34  ;;  %v822_v18 = vmul.f32 %v1961_v19, %v1961_v19  ;;  %v2010_v38 = vld [vmem:[%s2172_s5] ss:$0 sm:$0xff] }
 0x27d   : > { %v1970_v45 = vsub.f32 %v1875_v24, %v791_v40  ;;  %v1973_v25 = vsub.f32 %v1885_v31, %v792_v41  ;;  %v859_v46 = vsel %vm535_vm1, %v821_v42, 0.0  ;;  %v862_v47 = vsel %vm535_vm1, %v822_v18, 0.0 }
 0x27e   : > { %v776_v48 = vpop.xlane.xlu1 %775  ;;  %860 = vadd.xlane.f32.xlu1 %v859_v46  ;;  %863 = vadd.xlane.f32.xlu0 %v862_v47 }
 0x27f   : > { %v793_v49 = vmul.f32 0.03125, %v776_v48  ;;  %v823_v50 = vmul.f32 %v1970_v45, %v1970_v45  ;;  %v824_v51 = vmul.f32 %v1973_v25, %v1973_v25 }
 0x281   : > { %v1982_v24 = vsub.f32 %v1883_v30, %v793_v49  ;;  %v865_v31 = vsel %vm535_vm1, %v823_v50, 0.0  ;;  %v868_v54 = vsel %vm535_vm1, %v824_v51, 0.0 }
 0x282   : > { %866 = vadd.xlane.f32.xlu1 %v865_v31  ;;  %869 = vadd.xlane.f32.xlu0 %v868_v54 }
 0x283   : > { %v825_v55 = vmul.f32 %v1982_v24, %v1982_v24 }
 0x285   : > { %v871_v30 = vsel %vm535_vm1, %v825_v55, 0.0 }
 0x286   : > { %872 = vadd.xlane.f32.xlu1 %v871_v30 }
 0x2f3   : > { %v828_v1 = vpop.xlane.xlu0 %827 }
 0x2f4   : > { %v874_v2 = vmul.f32 0.03125, %v828_v1 }
 0x2f6   : > { %v890_v3 = vadd.f32 1e-05, %v874_v2 }
 0x2f7   : > { %v831_v4 = vpop.xlane.xlu1 %830  ;;  %v834_v5 = vpop.xlane.xlu0 %833 }
 0x2f8   : > { %1634 = vrsqrt.f32 %v890_v3  ;;  %v875_v8 = vmul.f32 0.03125, %v831_v4  ;;  %v876_v9 = vmul.f32 0.03125, %v834_v5 }
 0x2fa   : > { %v891_v0 = vadd.f32 1e-05, %v875_v8  ;;  %v892_v11 = vadd.f32 1e-05, %v876_v9 }
 0x2fb   : > { %v837_v14 = vpop.xlane.xlu1 %836  ;;  %v840_v15 = vpop.xlane.xlu0 %839 }
 0x2fc   : > { %1636 = vrsqrt.f32 %v891_v0  ;;  %v877_v16 = vmul.f32 0.03125, %v837_v14  ;;  %v878_v17 = vmul.f32 0.03125, %v840_v15 }
 0x2fd   : > { %1638 = vrsqrt.f32 %v892_v11 }
 0x2fe   : > { %v893_v20 = vadd.f32 1e-05, %v877_v16  ;;  %v894_v21 = vadd.f32 1e-05, %v878_v17 }
 0x2ff   : > { %v843_v6 = vpop.xlane.xlu1 %842  ;;  %v846_v23 = vpop.xlane.xlu0 %845 }
 0x300   : > { %1640 = vrsqrt.f32 %v893_v20  ;;  %v879_v26 = vmul.f32 0.03125, %v843_v6  ;;  %v880_v27 = vmul.f32 0.03125, %v846_v23 }
 0x301   : > { %1642 = vrsqrt.f32 %v894_v21 }
 0x302   : > { %v1635_v28 = vpop.eup %1634  ;;  %v895_v32 = vadd.f32 1e-05, %v879_v26  ;;  %v896_v33 = vadd.f32 1e-05, %v880_v27 }
 0x303   : > { %v849_v12 = vpop.xlane.xlu1 %848  ;;  %v852_v35 = vpop.xlane.xlu0 %851  ;;  %v922_v36 = vmul.f32 %v1635_v28, %v1894_v37 }
 0x304   : > { %1644 = vrsqrt.f32 %v895_v32  ;;  %v881_v39 = vmul.f32 0.03125, %v849_v12  ;;  %v882_v40 = vmul.f32 0.03125, %v852_v35 }
 0x305   : > { %1646 = vrsqrt.f32 %v896_v33  ;;  %v945_v41 = vmul.f32 %v2004_v29, %v922_v36 }
 0x306   : > { %v1637_v42 = vpop.eup %1636  ;;  %v897_v18 = vadd.f32 1e-05, %v881_v39  ;;  %v898_v46 = vadd.f32 1e-05, %v882_v40 }
 0x307   : > { %v1639_v47 = vpop.eup %1638  ;;  %v923_v48 = vmul.f32 %v1637_v42, %v1902_v44  ;;  %v855_v49 = vpop.xlane.xlu1 %854  ;;  %v968_v37 = vadd.f32 %v2010_v38, %v945_v41 }
 0x308   : > { %v858_v50 = vpop.xlane.xlu0 %857  ;;  %1648 = vrsqrt.f32 %v897_v18  ;;  %v883_v51 = vmul.f32 0.03125, %v855_v49  ;;  %v924_v54 = vmul.f32 %v1639_v47, %v1899_v43 }
 0x309   : > { %v884_v31 = vmul.f32 0.03125, %v858_v50  ;;  %v946_v55 = vmul.f32 %v2004_v29, %v923_v48  ;;  %1650 = vrsqrt.f32 %v898_v46  ;;  %1565 = vmatprep.mubr.msk.f32.mxu1 %vm535_vm1, %v968_v37 }
 0x30a   : > { %v1641_v56 = vpop.eup %1640  ;;  %v899_v57 = vadd.f32 1e-05, %v883_v51  ;;  %v947_v30 = vmul.f32 %v2004_v29, %v924_v54 }
 0x30b   : > { %v900_v58 = vadd.f32 1e-05, %v884_v31  ;;  %v1643_v44 = vpop.eup %1642  ;;  %v969_v60 = vadd.f32 %v2010_v38, %v946_v55  ;;  %v861_v61 = vpop.xlane.xlu1 %860  ;;  %v925_v1 = vmul.f32 %v1641_v56, %v1910_v52 }
 0x30c   : > { %v864_v59 = vpop.xlane.xlu0 %863  ;;  %1652 = vrsqrt.f32 %v899_v57  ;;  %v885_v2 = vmul.f32 0.03125, %v861_v61  ;;  %v970_v3 = vadd.f32 %v2010_v38, %v947_v30  ;;  %v926_v5 = vmul.f32 %v1643_v44, %v1913_v53 }
 0x30d   : > { %v886_v43 = vmul.f32 0.03125, %v864_v59  ;;  %1654 = vrsqrt.f32 %v900_v58  ;;  %1566 = vmatmul.mubr.msk.f32.vlgmr.msra.gmra.mrb[10].mxu1 %vm535_vm1, %v969_v60  ;;  %v948_v4 = vmul.f32 %v2004_v29, %v925_v1 }
 0x30e   : > { %v1645_v8 = vpop.eup %1644  ;;  %v901_v9 = vadd.f32 1e-05, %v885_v2  ;;  %1568 = vmatprep.mubr.msk.f32.mxu1 %vm535_vm1, %v970_v3  ;;  %v949_v16 = vmul.f32 %v2004_v29, %v926_v5  ;;  %v1384_v3 = vld [vmem:[%s2174_s7] ss:$0 sm:$0xff] }
 0x30f   : > { %v902_v0 = vadd.f32 1e-05, %v886_v43  ;;  %v1647_v11 = vpop.eup %1646  ;;  %v867_v14 = vpop.xlane.xlu1 %866  ;;  %v971_v15 = vadd.f32 %v2010_v38, %v948_v4  ;;  %v927_v17 = vmul.f32 %v1645_v8, %v1922_v62 }
 0x310   : > { %v870_v52 = vpop.xlane.xlu0 %869  ;;  %1656 = vrsqrt.f32 %v901_v9  ;;  %v887_v20 = vmul.f32 0.03125, %v867_v14  ;;  %v928_v6 = vmul.f32 %v1647_v11, %v1925_v63  ;;  %v972_v53 = vadd.f32 %v2010_v38, %v949_v16 }
 0x311   : > { %v888_v21 = vmul.f32 0.03125, %v870_v52  ;;  %1658 = vrsqrt.f32 %v902_v0  ;;  %1569 = vmatmul.mubr.msk.f32.gmra.mrb[12].mxu1 %vm535_vm1, %v971_v15  ;;  %v950_v23 = vmul.f32 %v2004_v29, %v927_v17 }
 0x312   : > { %v1649_v26 = vpop.eup %1648  ;;  %v903_v27 = vadd.f32 1e-05, %v887_v20  ;;  %v951_v32 = vmul.f32 %v2004_v29, %v928_v6  ;;  %1571 = vmatprep.mubr.msk.f32.mxu1 %vm535_vm1, %v972_v53 }
 0x313   : > { %v904_v28 = vadd.f32 1e-05, %v888_v21  ;;  %v1651_v33 = vpop.eup %1650  ;;  %v873_v62 = vpop.xlane.xlu1 %872  ;;  %v973_v12 = vadd.f32 %v2010_v38, %v950_v23  ;;  %v929_v63 = vmul.f32 %v1649_v26, %v1934_v10 }
 0x314   : > { %1660 = vrsqrt.f32 %v903_v27  ;;  %v889_v35 = vmul.f32 0.03125, %v873_v62  ;;  %v974_v36 = vadd.f32 %v2010_v38, %v951_v32  ;;  %v930_v39 = vmul.f32 %v1651_v33, %v1937_v7 }
 0x315   : > { %1662 = vrsqrt.f32 %v904_v28  ;;  %1572 = vmatmul.mubr.msk.f32.gmra.mrb[14].mxu1 %vm535_vm1, %v973_v12  ;;  %v952_v40 = vmul.f32 %v2004_v29, %v929_v63 }
 0x316   : > { %v1653_v41 = vpop.eup %1652  ;;  %v905_v42 = vadd.f32 1e-05, %v889_v35  ;;  %1574 = vmatprep.mubr.msk.f32.mxu1 %vm535_vm1, %v974_v36  ;;  %v953_v18 = vmul.f32 %v2004_v29, %v930_v39 }
 0x317   : > { %v1655_v46 = vpop.eup %1654  ;;  %v975_v10 = vadd.f32 %v2010_v38, %v952_v40  ;;  %v931_v47 = vmul.f32 %v1653_v41, %v1946_v22 }
 0x318   : > { %1664 = vrsqrt.f32 %v905_v42  ;;  %v976_v48 = vadd.f32 %v2010_v38, %v953_v18  ;;  %v932_v7 = vmul.f32 %v1655_v46, %v1949_v13 }
 0x319   : > { %1575 = vmatmul.mubr.msk.f32.gmra.mrb[16].mxu1 %vm535_vm1, %v975_v10  ;;  %v954_v49 = vmul.f32 %v2004_v29, %v931_v47 }
 0x31a   : > { %v1657_v50 = vpop.eup %1656  ;;  %1577 = vmatprep.mubr.msk.f32.mxu1 %vm535_vm1, %v976_v48  ;;  %v955_v37 = vmul.f32 %v2004_v29, %v932_v7 }
 0x31b   : > { %v1659_v51 = vpop.eup %1658  ;;  %v977_v31 = vadd.f32 %v2010_v38, %v954_v49  ;;  %v933_v54 = vmul.f32 %v1657_v50, %v1958_v34 }
 0x31c   : > { %v978_v22 = vadd.f32 %v2010_v38, %v955_v37  ;;  %v934_v55 = vmul.f32 %v1659_v51, %v1961_v19 }
 0x31d   : > { %1578 = vmatmul.mubr.msk.f32.gmra.mrb[18].mxu1 %vm535_vm1, %v977_v31  ;;  %v956_v13 = vmul.f32 %v2004_v29, %v933_v54 }
 0x31e   : > { %v1661_v56 = vpop.eup %1660  ;;  %1580 = vmatprep.mubr.msk.f32.mxu1 %vm535_vm1, %v978_v22  ;;  %v957_v57 = vmul.f32 %v2004_v29, %v934_v55 }
 0x31f   : > { %v1663_v58 = vpop.eup %1662  ;;  %v979_v30 = vadd.f32 %v2010_v38, %v956_v13  ;;  %v935_v44 = vmul.f32 %v1661_v56, %v1970_v45 }
 0x320   : > { %v980_v34 = vadd.f32 %v2010_v38, %v957_v57  ;;  %v936_v60 = vmul.f32 %v1663_v58, %v1973_v25 }
 0x321   : > { %1581 = vmatmul.mubr.msk.f32.gmra.mrb[20].mxu1 %vm535_vm1, %v979_v30  ;;  %v958_v19 = vmul.f32 %v2004_v29, %v935_v44 }
 0x322   : > { %v1665_v61 = vpop.eup %1664  ;;  %1583 = vmatprep.mubr.msk.f32.mxu1 %vm535_vm1, %v980_v34  ;;  %v959_v59 = vmul.f32 %v2004_v29, %v936_v60 }
 0x323   : > { %v981_v1 = vadd.f32 %v2010_v38, %v958_v19  ;;  %v937_v2 = vmul.f32 %v1665_v61, %v1982_v24 }
 0x324   : > { %v982_v45 = vadd.f32 %v2010_v38, %v959_v59 }
 0x325   : > { %1584 = vmatmul.mubr.msk.f32.gmra.mrb[22].mxu1 %vm535_vm1, %v981_v1  ;;  %v960_v43 = vmul.f32 %v2004_v29, %v937_v2 }
 0x326   : > { %1586 = vmatprep.mubr.msk.f32.mxu1 %vm535_vm1, %v982_v45 }
 0x327   : > { %v983_v25 = vadd.f32 %v2010_v38, %v960_v43 }
 0x329   : > { %1587 = vmatmul.mubr.msk.f32.gmra.mrb[24].mxu1 %vm535_vm1, %v983_v25 }
 0x3e0   : > { %v1567_v24 = vpop.f32.mrb[10].mxu1 }
 0x3e1   : > { %v1115_v29 = vadd.f32 %v1567_v24, %v1384_v3  ;;  %v1109_v4 = vpop.f32.mrb[11].mxu1 }
 0x3e2   : > { %v1110_v38 = vadd.f32 %v1384_v3, %v1109_v4 }
 0x3e3   : > { %1189 = vst.msk [vmem:[%s2082_s10 + $0x8] sm:$0xff] %vm535_vm1, %v1115_v29  ;;  %1222 = vrot.lane.b32.xlu1 %v1115_v29, %s1674_s28 }
 0x3e4   : > { %1188 = vst.msk [vmem:[%s2082_s10] sm:$0xff] %vm535_vm1, %v1110_v38  ;;  %1220 = vrot.lane.b32.xlu0 %v1110_v38, %s1674_s28  ;;  %v1570_v5 = vpop.f32.mrb[12].mxu1 }
 0x3e5   : > { %v1125_v8 = vadd.f32 %v1570_v5, %v1384_v3  ;;  %v1119_v9 = vpop.f32.mrb[13].mxu1 }
 0x3e6   : > { %v1120_v0 = vadd.f32 %v1384_v3, %v1119_v9 }
 0x3e7   : > { %1191 = vst.msk [vmem:[%s2082_s10 + $0x18] sm:$0xff] %vm535_vm1, %v1125_v8  ;;  %1226 = vrot.lane.b32.xlu1 %v1125_v8, %s1674_s28 }
 0x3e8   : > { %1190 = vst.msk [vmem:[%s2082_s10 + $0x10] sm:$0xff] %vm535_vm1, %v1120_v0  ;;  %v1573_v11 = vpop.f32.mrb[14].mxu1 }
 0x3e9   : > { %v1135_v14 = vadd.f32 %v1573_v11, %v1384_v3  ;;  %v1129_v52 = vpop.f32.mrb[15].mxu1 }
 0x3ea   : > { %v1130_v15 = vadd.f32 %v1384_v3, %v1129_v52 }
 0x3eb   : > { %1193 = vst.msk [vmem:[%s2082_s10 + $0x28] sm:$0xff] %vm535_vm1, %v1135_v14  ;;  %1224 = vrot.lane.b32.xlu1 %v1120_v0, %s1674_s28 }
 0x3ec   : > { %1192 = vst.msk [vmem:[%s2082_s10 + $0x20] sm:$0xff] %vm535_vm1, %v1130_v15  ;;  %1228 = vrot.lane.b32.xlu0 %v1130_v15, %s1674_s28  ;;  %v1576_v16 = vpop.f32.mrb[16].mxu1 }
 0x3ed   : > { %v1145_v17 = vadd.f32 %v1576_v16, %v1384_v3  ;;  %v1139_v20 = vpop.f32.mrb[17].mxu1 }
 0x3ee   : > { %v1140_v21 = vadd.f32 %v1384_v3, %v1139_v20 }
 0x3ef   : > { %1195 = vst.msk [vmem:[%s2082_s10 + $0x38] sm:$0xff] %vm535_vm1, %v1145_v17  ;;  %1230 = vrot.lane.b32.xlu1 %v1135_v14, %s1674_s28 }
 0x3f0   : > { %1194 = vst.msk [vmem:[%s2082_s10 + $0x30] sm:$0xff] %vm535_vm1, %v1140_v21  ;;  %1232 = vrot.lane.b32.xlu0 %v1140_v21, %s1674_s28  ;;  %v1579_v6 = vpop.f32.mrb[18].mxu1 }
 0x3f1   : > { %v1155_v53 = vadd.f32 %v1579_v6, %v1384_v3  ;;  %v1149_v23 = vpop.f32.mrb[19].mxu1 }
 0x3f2   : > { %v1150_v26 = vadd.f32 %v1384_v3, %v1149_v23 }
 0x3f3   : > { %1197 = vst.msk [vmem:[%s2082_s10 + $0x48] sm:$0xff] %vm535_vm1, %v1155_v53  ;;  %1234 = vrot.lane.b32.xlu1 %v1145_v17, %s1674_s28 }
 0x3f4   : > { %1196 = vst.msk [vmem:[%s2082_s10 + $0x40] sm:$0xff] %vm535_vm1, %v1150_v26  ;;  %1236 = vrot.lane.b32.xlu0 %v1150_v26, %s1674_s28  ;;  %v1582_v27 = vpop.f32.mrb[20].mxu1 }
 0x3f5   : > { %v1165_v28 = vadd.f32 %v1582_v27, %v1384_v3  ;;  %v1159_v32 = vpop.f32.mrb[21].mxu1 }
 0x3f6   : > { %v1160_v33 = vadd.f32 %v1384_v3, %v1159_v32 }
 0x3f7   : > { %1199 = vst.msk [vmem:[%s2082_s10 + $0x58] sm:$0xff] %vm535_vm1, %v1165_v28  ;;  %1238 = vrot.lane.b32.xlu1 %v1155_v53, %s1674_s28 }
 0x3f8   : > { %1198 = vst.msk [vmem:[%s2082_s10 + $0x50] sm:$0xff] %vm535_vm1, %v1160_v33  ;;  %1240 = vrot.lane.b32.xlu0 %v1160_v33, %s1674_s28  ;;  %v1585_v62 = vpop.f32.mrb[22].mxu1 }
 0x3f9   : > { %v1175_v12 = vadd.f32 %v1585_v62, %v1384_v3  ;;  %v1169_v63 = vpop.f32.mrb[23].mxu1 }
 0x3fa   : > { %v1170_v35 = vadd.f32 %v1384_v3, %v1169_v63 }
 0x3fb   : > { %1201 = vst.msk [vmem:[%s2082_s10 + $0x68] sm:$0xff] %vm535_vm1, %v1175_v12  ;;  %1242 = vrot.lane.b32.xlu1 %v1165_v28, %s1674_s28 }
 0x3fc   : > { %1200 = vst.msk [vmem:[%s2082_s10 + $0x60] sm:$0xff] %vm535_vm1, %v1170_v35  ;;  %1244 = vrot.lane.b32.xlu0 %v1170_v35, %s1674_s28  ;;  %v1588_v36 = vpop.f32.mrb[24].mxu1 }
 0x3fd   : > { %v1185_v39 = vadd.f32 %v1588_v36, %v1384_v3  ;;  %v1179_v40 = vpop.f32.mrb[25].mxu1 }
 0x3fe   : > { %v1180_v41 = vadd.f32 %v1384_v3, %v1179_v40 }
 0x3ff   : > { %1203 = vst.msk [vmem:[%s2082_s10 + $0x78] sm:$0xff] %vm535_vm1, %v1185_v39  ;;  %1246 = vrot.lane.b32.xlu1 %v1175_v12, %s1674_s28 }
 0x400   : > { %1202 = vst.msk [vmem:[%s2082_s10 + $0x70] sm:$0xff] %vm535_vm1, %v1180_v41  ;;  %1248 = vrot.lane.b32.xlu0 %v1180_v41, %s1674_s28 }
 0x403   : > { %1250 = vrot.lane.b32.xlu1 %v1185_v39, %s1674_s28 }
 0x455   : > { %v1223_v42 = vpop.permute.xlu1 %1222 }
 0x456   : > { %1402 = vst.msk [vmem:[%s2082_s10 + $0x88] sm:$0xff] %vm535_vm1, %v1223_v42  ;;  %v1221_v18 = vpop.permute.xlu0 %1220 }
 0x457   : > { %1401 = vst.msk [vmem:[%s2082_s10 + $0x80] sm:$0xff] %vm535_vm1, %v1221_v18 }
 0x459   : > { %v1227_v46 = vpop.permute.xlu1 %1226 }
 0x45a   : > { %1404 = vst.msk [vmem:[%s2082_s10 + $0x98] sm:$0xff] %vm535_vm1, %v1227_v46 }
 0x45d   : > { %v1225_v10 = vpop.permute.xlu1 %1224 }
 0x45e   : > { %1403 = vst.msk [vmem:[%s2082_s10 + $0x90] sm:$0xff] %vm535_vm1, %v1225_v10  ;;  %v1229_v47 = vpop.permute.xlu0 %1228 }
 0x45f   : > { %1405 = vst.msk [vmem:[%s2082_s10 + $0xa0] sm:$0xff] %vm535_vm1, %v1229_v47 }
 0x461   : > { %v1231_v48 = vpop.permute.xlu1 %1230 }
 0x462   : > { %1406 = vst.msk [vmem:[%s2082_s10 + $0xa8] sm:$0xff] %vm535_vm1, %v1231_v48  ;;  %v1233_v7 = vpop.permute.xlu0 %1232 }
 0x463   : > { %1407 = vst.msk [vmem:[%s2082_s10 + $0xb0] sm:$0xff] %vm535_vm1, %v1233_v7 }
 0x465   : > { %v1235_v49 = vpop.permute.xlu1 %1234 }
 0x466   : > { %1408 = vst.msk [vmem:[%s2082_s10 + $0xb8] sm:$0xff] %vm535_vm1, %v1235_v49  ;;  %v1237_v50 = vpop.permute.xlu0 %1236 }
 0x467   : > { %1409 = vst.msk [vmem:[%s2082_s10 + $0xc0] sm:$0xff] %vm535_vm1, %v1237_v50 }
 0x469   : > { %v1239_v37 = vpop.permute.xlu1 %1238 }
 0x46a   : > { %1410 = vst.msk [vmem:[%s2082_s10 + $0xc8] sm:$0xff] %vm535_vm1, %v1239_v37  ;;  %v1241_v51 = vpop.permute.xlu0 %1240 }
 0x46b   : > { %1411 = vst.msk [vmem:[%s2082_s10 + $0xd0] sm:$0xff] %vm535_vm1, %v1241_v51 }
 0x46d   : > { %v1243_v31 = vpop.permute.xlu1 %1242 }
 0x46e   : > { %1412 = vst.msk [vmem:[%s2082_s10 + $0xd8] sm:$0xff] %vm535_vm1, %v1243_v31  ;;  %v1245_v54 = vpop.permute.xlu0 %1244 }
 0x46f   : > { %1413 = vst.msk [vmem:[%s2082_s10 + $0xe0] sm:$0xff] %vm535_vm1, %v1245_v54 }
 0x471   : > { %v1247_v22 = vpop.permute.xlu1 %1246 }
 0x472   : > { %1414 = vst.msk [vmem:[%s2082_s10 + $0xe8] sm:$0xff] %vm535_vm1, %v1247_v22  ;;  %v1249_v55 = vpop.permute.xlu0 %1248 }
 0x473   : > { %1415 = vst.msk [vmem:[%s2082_s10 + $0xf0] sm:$0xff] %vm535_vm1, %v1249_v55 }
 0x475   : > { %v1251_v13 = vpop.permute.xlu1 %1250 }
 0x476   : > { %1416 = vst.msk [vmem:[%s2082_s10 + $0xf8] sm:$0xff] %vm535_vm1, %v1251_v13 }
 0x477 PF: > { %s18_s27 = sadd.s32 1, %s1672_s27  }
 0x478   : > { %p15_p4 = scmp.ge.s32.totalorder %s18_s27, 4  }
 0x47a   :  { %17 = sbr.rel (!%p15_p4) target bundleno = 1 (0x1), region = 83 }

</bundles_post_ra>
